<compile_context>
chip_gen: v5e
topology: v5e:2x2
jax: 0.10.0
libtpu: 0.0.40
codegen_flags: <defaults>
</compile_context>

<pallas_src>
import jax
import jax.numpy as jnp
from jax.experimental import pallas as pl
from jax.experimental.pallas import tpu as pltpu

NUM_CLASSES = 16
LANES = 128      # TPU lane width; class dim is zero-padded up to this
SUBLANES = 8


# ----------------------------------------------------------------------------
# helpers
# ----------------------------------------------------------------------------
def _round_up(x, m):
    return ((x + m - 1) // m) * m


def _pad2d(a, rows, cols):
    pr, pc = rows - a.shape[0], cols - a.shape[1]
    if pr == 0 and pc == 0:
        return a
    return jnp.pad(a, ((0, pr), (0, pc)))


def _pick_tm(B):
    """Batch tile: multiple of 8 that divides the padded batch, <=512; when the
    batch is large, cap so there are >=2 batch tiles (v7x dual-TensorCore)."""
    B8 = _round_up(B, 8)
    max_tm = min(512, B8)
    if B8 > 256:
        max_tm = min(max_tm, max(8, (B8 // 2) // 8 * 8))
    tm = 8
    t = 8
    while t <= max_tm:
        if B8 % t == 0:
            tm = t
        t += 8
    return tm, B8


def _pick_tk(D):
    """K tile: multiple of 128 that divides the padded feature dim, <=2048."""
    D128 = _round_up(D, 128)
    max_tk = min(2048, D128)
    tk = 128
    t = 128
    while t <= max_tk:
        if D128 % t == 0:
            tk = t
        t += 128
    return tk, D128


def _masked_log_softmax(z, col_valid):
    """log_softmax over the valid lanes only (pad lanes get a huge-negative)."""
    zm = jnp.where(col_valid, z, -1e30)
    m = jnp.max(zm, axis=1, keepdims=True)
    e = jnp.where(col_valid, jnp.exp(zm - m), 0.0)
    lse = jnp.log(jnp.sum(e, axis=1, keepdims=True)) + m
    return zm - lse


# ----------------------------------------------------------------------------
# Fused kernel: teacher matmul (over K grid axis) + distillation loss epilogue
# ----------------------------------------------------------------------------
def _make_fused_kernel(*, alpha, tau, softmax_target, distillation_type,
                       has_kd, w_resident, b_real, c_real, tm, tk):
    alpha = float(alpha)
    tau = float(tau)
    NP = LANES

    def kernel(*refs):
        if has_kd:
            (x_ref, w_ref, b_ref, out_ref, kd_ref,
             lab_ref, loss_ref, acc_ref) = refs
        else:
            (x_ref, w_ref, b_ref, out_ref,
             lab_ref, loss_ref, acc_ref) = refs
            kd_ref = out_ref  # reuse: avoid a duplicate DMA / load

        i = pl.program_id(0)           # batch tile
        k = pl.program_id(1)           # K (reduction) tile
        nk = pl.num_programs(1)

        @pl.when(k == 0)
        def _init():
            acc_ref[...] = jnp.zeros_like(acc_ref)

        # Teacher matmul partial product on the MXU.  x is streamed as f32 and
        # cast to bf16 per tile (no wrapper-side copy of the largest tensor);
        # accumulation stays f32.
        if w_resident:
            start = pl.multiple_of(k * tk, tk)
            w_tile = w_ref[pl.ds(start, tk), :]
        else:
            w_tile = w_ref[...]
        acc_ref[...] += jnp.dot(x_ref[...].astype(jnp.bfloat16), w_tile,
                                preferred_element_type=jnp.float32)

        @pl.when(k == nk - 1)
        def _epilogue():
            teacher = acc_ref[...] + b_ref[...]                  # (tm, NP) f32
            student = out_ref[...].astype(jnp.float32)
            student_kd = kd_ref[...].astype(jnp.float32) if has_kd else student
            labels = lab_ref[...]                                # (tm, 1) i32

            col = jax.lax.broadcasted_iota(jnp.int32, (tm, NP), 1)
            col_valid = col < c_real
            row_ids = i * tm + jax.lax.broadcasted_iota(jnp.int32, (tm, 1), 0)
            row_valid = (row_ids < b_real).astype(jnp.float32)
            inv_b = 1.0 / float(b_real)

            # ---- base criterion: CE(outputs, labels), mean reduction -------
            if alpha != 1.0:
                logp = _masked_log_softmax(student, col_valid)
                onehot = (col == labels) & col_valid
                ce_rows = -jnp.sum(jnp.where(onehot, logp, 0.0),
                                   axis=1, keepdims=True)
                base_rows = ce_rows * inv_b
            else:
                base_rows = jnp.zeros((tm, 1), jnp.float32)

            # ---- distillation term ------------------------------------------
            if distillation_type == "soft":
                T = tau
                tgt = teacher
                if softmax_target:
                    # Clamp keeps the log finite; identical to the PyTorch spec
                    # for its intended use (pre-softmaxed, non-negative teacher
                    # outputs), where PyTorch would NaN on negative raw logits.
                    tgt = jnp.log(jnp.maximum(tgt + 1e-10, 1e-10))
                log_s = _masked_log_softmax(student_kd * (1.0 / T), col_valid)
                log_t = _masked_log_softmax(tgt * (1.0 / T), col_valid)
                t_prob = jnp.where(col_valid, jnp.exp(log_t), 0.0)
                kl_rows = jnp.sum(
                    jnp.where(col_valid, t_prob * (log_t - log_s), 0.0),
                    axis=1, keepdims=True)
                dist_rows = kl_rows * jnp.float32(T * T / (b_real * c_real))
            elif distillation_type == "hard":
                # teacher argmax via max + first-occurrence (min of iota)
                t_masked = jnp.where(col_valid, teacher, -1e30)
                t_max = jnp.max(t_masked, axis=1, keepdims=True)
                is_max = (t_masked == t_max) & col_valid
                colf = col.astype(jnp.float32)
                t_arg = jnp.min(jnp.where(is_max, colf, float(NP)),
                                axis=1, keepdims=True)
                onehot_t = colf == t_arg
                logp_kd = _masked_log_softmax(student_kd, col_valid)
                ce_t = -jnp.sum(jnp.where(onehot_t, logp_kd, 0.0),
                                axis=1, keepdims=True)
                dist_rows = ce_t * inv_b
            else:
                dist_rows = jnp.zeros((tm, 1), jnp.float32)

            per_row = row_valid * (base_rows * jnp.float32(1.0 - alpha)
                                   + dist_rows * jnp.float32(alpha))
            # In-kernel reduction (XLU work, free under the DMA): one tiny
            # (8,128) partial per batch tile with the value at [0,0].
            tile_loss = jnp.sum(per_row)
            r8 = jax.lax.broadcasted_iota(jnp.int32, (SUBLANES, NP), 0)
            c8 = jax.lax.broadcasted_iota(jnp.int32, (SUBLANES, NP), 1)
            loss_ref[...] = jnp.where((r8 == 0) & (c8 == 0), tile_loss, 0.0)

    return kernel


def _fused_distill_loss(x_pad, w_pad, b_pad, out_pad, kd_pad, lab_pad, *,
                        alpha, tau, softmax_target, distillation_type,
                        b_real, c_real, tm, tk, w_resident):
    B_pad, D_pad = x_pad.shape
    nb = B_pad // tm
    nk = D_pad // tk
    has_kd = kd_pad is not None

    kernel = _make_fused_kernel(
        alpha=alpha, tau=tau, softmax_target=softmax_target,
        distillation_type=distillation_type, has_kd=has_kd,
        w_resident=w_resident, b_real=b_real, c_real=c_real, tm=tm, tk=tk)

    if w_resident:
        # Whole bf16 W lives in VMEM (constant block index -> DMA'd once),
        # removing the nb-fold W re-read from HBM entirely.
        w_spec = pl.BlockSpec((D_pad, LANES), lambda i, k: (0, 0))
    else:
        w_spec = pl.BlockSpec((tk, LANES), lambda i, k: (k, 0))

    in_specs = [
        pl.BlockSpec((tm, tk), lambda i, k: (i, k)),       # x (f32, cast in-kernel)
        w_spec,                                            # W (bf16)
        pl.BlockSpec((1, LANES), lambda i, k: (0, 0)),     # bias (f32)
        pl.BlockSpec((tm, LANES), lambda i, k: (i, 0)),    # student logits
    ]
    args = [x_pad, w_pad, b_pad, out_pad]
    if has_kd:
        in_specs.append(pl.BlockSpec((tm, LANES), lambda i, k: (i, 0)))
        args.append(kd_pad)
    in_specs.append(pl.BlockSpec((tm, 1), lambda i, k: (i, 0)))  # labels
    args.append(lab_pad)

    flops = 2 * B_pad * D_pad * LANES
    w_bytes = D_pad * LANES * 2 * (1 if w_resident else nb)
    bytes_accessed = (x_pad.size * 4                       # x read as f32
                      + w_bytes                            # W (resident or re-streamed)
                      + out_pad.size * 4 * (2 if has_kd else 1)
                      + B_pad * 4                          # labels
                      + nb * SUBLANES * LANES * 4)         # reduced loss output
    transcendentals = B_pad * LANES * 4

    # VMEM footprint (tm=512, tk=2048 worst case): x 2*4 MiB + W <=2*4 MiB
    # + small epilogue blocks + acc ~0.3 MiB  =>  well inside 32 MiB scoped
    # limit on every generation (v5e needs the explicit raise from 16 MiB).
    grid_spec = pltpu.PrefetchScalarGridSpec(
        num_scalar_prefetch=0,
        grid=(nb, nk),                                   # K (reduction) last
        in_specs=in_specs,
        out_specs=pl.BlockSpec((SUBLANES, LANES), lambda i, k: (i, 0)),
        scratch_shapes=[pltpu.VMEM((tm, LANES), jnp.float32)],
    )

    out = pl.pallas_call(
        kernel,
        out_shape=jax.ShapeDtypeStruct((nb * SUBLANES, LANES), jnp.float32),
        grid_spec=grid_spec,
        compiler_params=pltpu.CompilerParams(
            dimension_semantics=("parallel", "arbitrary"),
            vmem_limit_bytes=32 * 1024 * 1024,
        ),
        cost_estimate=pl.CostEstimate(
            flops=flops, transcendentals=transcendentals,
            bytes_accessed=bytes_accessed),
    )(*args)
    # per-batch-tile partial contributions (value at [0,0] of each (8,128)
    # slab) -> scalar loss
    return jnp.sum(out)


# ----------------------------------------------------------------------------
# distillation_type == 'none': base criterion (cross-entropy) only
# ----------------------------------------------------------------------------
def _make_ce_kernel(b_real, c_real, tm):
    NP = LANES

    def kernel(out_ref, lab_ref, loss_ref):
        i = pl.program_id(0)
        logits = out_ref[...].astype(jnp.float32)
        labels = lab_ref[...]
        col = jax.lax.broadcasted_iota(jnp.int32, (tm, NP), 1)
        col_valid = col < c_real
        row_ids = i * tm + jax.lax.broadcasted_iota(jnp.int32, (tm, 1), 0)
        row_valid = (row_ids < b_real).astype(jnp.float32)
        logp = _masked_log_softmax(logits, col_valid)
        onehot = (col == labels) & col_valid
        ce_rows = -jnp.sum(jnp.where(onehot, logp, 0.0), axis=1, keepdims=True)
        per_row = row_valid * ce_rows * (1.0 / float(b_real))
        tile_loss = jnp.sum(per_row)
        r8 = jax.lax.broadcasted_iota(jnp.int32, (SUBLANES, NP), 0)
        c8 = jax.lax.broadcasted_iota(jnp.int32, (SUBLANES, NP), 1)
        loss_ref[...] = jnp.where((r8 == 0) & (c8 == 0), tile_loss, 0.0)

    return kernel


def _cross_entropy_pallas(outputs, labels):
    B, C = outputs.shape
    assert C <= LANES
    tm, B_pad = _pick_tm(B)
    nb = B_pad // tm
    out_pad = _pad2d(outputs.astype(jnp.float32), B_pad, LANES)
    lab_pad = _pad2d(labels.astype(jnp.int32).reshape(-1, 1), B_pad, 1)

    grid_spec = pltpu.PrefetchScalarGridSpec(
        num_scalar_prefetch=0,
        grid=(nb,),
        in_specs=[pl.BlockSpec((tm, LANES), lambda i: (i, 0)),
                  pl.BlockSpec((tm, 1), lambda i: (i, 0))],
        out_specs=pl.BlockSpec((SUBLANES, LANES), lambda i: (i, 0)),
    )
    out = pl.pallas_call(
        _make_ce_kernel(B, C, tm),
        out_shape=jax.ShapeDtypeStruct((nb * SUBLANES, LANES), jnp.float32),
        grid_spec=grid_spec,
        compiler_params=pltpu.CompilerParams(
            dimension_semantics=("parallel",),
            vmem_limit_bytes=32 * 1024 * 1024),
    )(out_pad, lab_pad)
    return jnp.sum(out)


# ----------------------------------------------------------------------------
# DistillationLoss.forward equivalent
# ----------------------------------------------------------------------------
def distillation_loss_forward(inputs, outputs, labels, *, target_w, target_b,
                              distillation_type="soft", alpha=0.5, tau=2.0,
                              softmax_target=False):
    assert distillation_type in ("none", "soft", "hard")

    outputs_kd = None
    if isinstance(outputs, (tuple, list)):
        outputs, outputs_kd = outputs

    if distillation_type == "none":
        # base criterion only; teacher forward and KD math skipped entirely.
        return _cross_entropy_pallas(outputs, labels)

    B, C = outputs.shape
    assert C <= LANES
    D = 1
    for s in inputs.shape[1:]:
        D *= s

    # tile sizes: divisors of the padded extents (pad becomes identity when the
    # shapes are already aligned), tm capped so v7x keeps >=2 batch tiles.
    tm, B_pad = _pick_tm(B)
    tk, D_pad = _pick_tk(D)

    # Keep the frozen bf16 teacher W fully VMEM-resident when small enough for
    # every generation (gated conservatively for v7x's 64 MiB VMEM).
    w_resident = (D_pad * LANES * 2) <= 4 * 1024 * 1024

    # x stays f32: no wrapper-side cast/copy pass over the largest tensor; the
    # kernel casts each tile to bf16 right before the MXU dot.
    x_flat = inputs.reshape(B, D).astype(jnp.float32)
    x_pad = _pad2d(x_flat, B_pad, D_pad)
    w_pad = _pad2d(target_w.astype(jnp.bfloat16), D_pad, LANES)
    b_pad = _pad2d(target_b.astype(jnp.float32).reshape(1, -1), 1, LANES)

    out_pad = _pad2d(outputs.astype(jnp.float32), B_pad, LANES)
    kd_pad = None
    if outputs_kd is not None and outputs_kd is not outputs:
        kd_pad = _pad2d(outputs_kd.astype(jnp.float32), B_pad, LANES)
    lab_pad = _pad2d(labels.astype(jnp.int32).reshape(-1, 1), B_pad, 1)

    # TODO(synk): output_dir target-prediction logging (host file I/O) skipped.
    return _fused_distill_loss(
        x_pad, w_pad, b_pad, out_pad, kd_pad, lab_pad,
        alpha=alpha, tau=tau, softmax_target=softmax_target,
        distillation_type=distillation_type,
        b_real=B, c_real=C, tm=tm, tk=tk, w_resident=w_resident)


# ----------------------------------------------------------------------------
# Pure-JAX reference (teacher matmul also in bf16 to mirror kernel precision)
# ----------------------------------------------------------------------------
def _reference(inputs, outputs, outputs_kd, labels, w, b, kind, alpha, tau):
    B = outputs.shape[0]
    logp = jax.nn.log_softmax(outputs, axis=1)
    base = -jnp.mean(logp[jnp.arange(B), labels])
    if kind == "none":
        return base
    x = inputs.reshape(B, -1).astype(jnp.bfloat16)
    tgt = jnp.dot(x, w.astype(jnp.bfloat16),
                  preferred_element_type=jnp.float32) + b
    if kind == "soft":
        log_s = jax.nn.log_softmax(outputs_kd / tau, axis=1)
        log_t = jax.nn.log_softmax(tgt / tau, axis=1)
        kl = jnp.sum(jnp.exp(log_t) * (log_t - log_s))
        distill = kl * (tau * tau) / outputs_kd.size
    else:  # hard
        t_idx = jnp.argmax(tgt, axis=1)
        distill = -jnp.mean(
            jax.nn.log_softmax(outputs_kd, axis=1)[jnp.arange(B), t_idx])
    return base * (1 - alpha) + distill * alpha


if __name__ == "__main__":
    key = jax.random.PRNGKey(0)
    kx, ko, kk, kl_, kw, kb = jax.random.split(key, 6)

    B, Cin, H, W = 2, 4, 16, 16
    D = Cin * H * W

    inputs = jax.random.normal(kx, (B, Cin, H, W), dtype=jnp.float32)
    outputs = jax.random.normal(ko, (B, NUM_CLASSES), dtype=jnp.float32)
    outputs_kd = jax.random.normal(kk, (B, NUM_CLASSES), dtype=jnp.float32)
    labels = jax.random.randint(kl_, (B,), 0, NUM_CLASSES, dtype=jnp.int32)

    # deterministic frozen "teacher" params (flatten -> linear)
    target_w = 0.02 * jax.random.normal(kw, (D, NUM_CLASSES), dtype=jnp.float32)
    target_b = 0.1 * jax.random.normal(kb, (NUM_CLASSES,), dtype=jnp.float32)

    alpha, tau = 0.5, 2.0

    # --- soft distillation, tuple outputs (separate distillation head) ------
    loss_soft = distillation_loss_forward(
        inputs, (outputs, outputs_kd), labels,
        target_w=target_w, target_b=target_b,
        distillation_type="soft", alpha=alpha, tau=tau, softmax_target=False)
    loss_soft = jax.block_until_ready(loss_soft)
    ref_soft = _reference(inputs, outputs, outputs_kd, labels,
                          target_w, target_b, "soft", alpha, tau)
    assert jnp.allclose(loss_soft, ref_soft, atol=1e-4, rtol=1e-4), (
        loss_soft, ref_soft)

    # --- hard distillation, single output tensor (kd reuses outputs) --------
    loss_hard = distillation_loss_forward(
        inputs, outputs, labels,
        target_w=target_w, target_b=target_b,
        distillation_type="hard", alpha=alpha, tau=tau, softmax_target=False)
    loss_hard = jax.block_until_ready(loss_hard)
    ref_hard = _reference(inputs, outputs, outputs, labels,
                          target_w, target_b, "hard", alpha, tau)
    assert jnp.allclose(loss_hard, ref_hard, atol=1e-4, rtol=1e-4), (
        loss_hard, ref_hard)

    # --- 'none': base criterion only -----------------------------------------
    loss_none = distillation_loss_forward(
        inputs, outputs, labels,
        target_w=target_w, target_b=target_b,
        distillation_type="none", alpha=alpha, tau=tau)
    loss_none = jax.block_until_ready(loss_none)
    ref_none = _reference(inputs, outputs, outputs, labels,
                          target_w, target_b, "none", alpha, tau)
    assert jnp.allclose(loss_none, ref_none, atol=1e-4, rtol=1e-4), (
        loss_none, ref_none)

    print("KERNEL_OK")
</pallas_src>

<mosaic_0001>
module attributes {stable_mosaic.version = 11 : i64} {
  func.func @kernel(%arg0: i32, %arg1: i32, %arg2: memref<8x1024xf32, #tpu.memory_space<vmem>>, %arg3: memref<1024x128xbf16, #tpu.memory_space<vmem>>, %arg4: memref<1x128xf32, #tpu.memory_space<vmem>>, %arg5: memref<8x128xf32, #tpu.memory_space<vmem>>, %arg6: memref<8x128xf32, #tpu.memory_space<vmem>>, %arg7: memref<8x1xi32, #tpu.memory_space<vmem>>, %arg8: memref<8x128xf32, #tpu.memory_space<vmem>>, %arg9: memref<8x128xf32, #tpu.memory_space<vmem>>) attributes {dimension_semantics = [#tpu.dimension_semantics<parallel>, #tpu.dimension_semantics<arbitrary>], iteration_bounds = array<i64: 1, 1>, scalar_prefetch = 0 : i64, scratch_operands = 1 : i64, tpu.core_type = #tpu.core_type<tc>, window_params = [{transform_indices = @transform_0, window_bounds = array<i64: 8, 1024>}, {pipeline_mode = #tpu.pipeline_mode<synchronous>, transform_indices = @transform_1, window_bounds = array<i64: 1024, 128>}, {pipeline_mode = #tpu.pipeline_mode<synchronous>, transform_indices = @transform_2, window_bounds = array<i64: 1, 128>}, {transform_indices = @transform_3, window_bounds = array<i64: 8, 128>}, {transform_indices = @transform_4, window_bounds = array<i64: 8, 128>}, {transform_indices = @transform_5, window_bounds = array<i64: 8, 1>}, {transform_indices = @transform_6, window_bounds = array<i64: 8, 128>}]} {
    %c0_i32 = arith.constant 0 : i32
    %0 = arith.cmpi eq, %arg1, %c0_i32 : i32
    %1 = arith.extui %0 : i1 to i32
    %c0_i32_0 = arith.constant 0 : i32
    %2 = arith.cmpi ne, %1, %c0_i32_0 : i32
    scf.if %2 {
      %cst_9 = arith.constant 0.000000e+00 : f32
      %16 = vector.broadcast %cst_9 : f32 to vector<8x128xf32>
      %c0_10 = arith.constant 0 : index
      %c0_11 = arith.constant 0 : index
      %17 = vector.load %arg9[%c0_10, %c0_11] : memref<8x128xf32, #tpu.memory_space<vmem>>, vector<8x128xf32>
      tpu.vector_store %arg9[%c0_10, %c0_11], %16 {strides = array<i32>} : memref<8x128xf32, #tpu.memory_space<vmem>>, vector<8x128xf32>,
    } else {
    }
    %c1024_i32 = arith.constant 1024 : i32
    %3 = arith.muli %arg1, %c1024_i32 : i32
    %4 = tpu.assume_multiple %3, 1024 : i32
    %5 = arith.index_cast %4 : i32 to index
    %c0 = arith.constant 0 : index
    %6 = vector.load %arg3[%5, %c0] : memref<1024x128xbf16, #tpu.memory_space<vmem>>, vector<1024x128xbf16>
    %c0_1 = arith.constant 0 : index
    %c0_2 = arith.constant 0 : index
    %7 = vector.load %arg9[%c0_1, %c0_2] : memref<8x128xf32, #tpu.memory_space<vmem>>, vector<8x128xf32>
    %c0_3 = arith.constant 0 : index
    %c0_4 = arith.constant 0 : index
    %8 = vector.load %arg2[%c0_3, %c0_4] : memref<8x1024xf32, #tpu.memory_space<vmem>>, vector<8x1024xf32>
    %9 = arith.truncf %8 : vector<8x1024xf32> to vector<8x1024xbf16>
    %cst = arith.constant dense<0.000000e+00> : vector<8x128xf32>
    %10 = tpu.matmul %9, %6, %cst {dimension_numbers = #tpu.dot_dimension_numbers<[1], [0], [0], [1], [0, 0, 1, 1], [], []>} : vector<8x1024xbf16>, vector<1024x128xbf16>, vector<8x128xf32> -> vector<8x128xf32>
    %11 = arith.addf %7, %10 : vector<8x128xf32>
    %c0_5 = arith.constant 0 : index
    %c0_6 = arith.constant 0 : index
    %12 = vector.load %arg9[%c0_5, %c0_6] : memref<8x128xf32, #tpu.memory_space<vmem>>, vector<8x128xf32>
    tpu.vector_store %arg9[%c0_5, %c0_6], %11 {strides = array<i32>} : memref<8x128xf32, #tpu.memory_space<vmem>>, vector<8x128xf32>,
    %c0_i32_7 = arith.constant 0 : i32
    %13 = arith.cmpi eq, %arg1, %c0_i32_7 : i32
    %14 = arith.extui %13 : i1 to i32
    %c0_i32_8 = arith.constant 0 : i32
    %15 = arith.cmpi ne, %14, %c0_i32_8 : i32
    scf.if %15 {
      %c0_9 = arith.constant 0 : index
      %c0_10 = arith.constant 0 : index
      %16 = vector.load %arg9[%c0_9, %c0_10] : memref<8x128xf32, #tpu.memory_space<vmem>>, vector<8x128xf32>
      %c0_11 = arith.constant 0 : index
      %c0_12 = arith.constant 0 : index
      %17 = vector.load %arg4[%c0_11, %c0_12] : memref<1x128xf32, #tpu.memory_space<vmem>>, vector<1x128xf32>
      %18 = vector.broadcast %17 : vector<1x128xf32> to vector<8x128xf32>
      %19 = arith.addf %16, %18 : vector<8x128xf32>
      %c0_13 = arith.constant 0 : index
      %c0_14 = arith.constant 0 : index
      %20 = vector.load %arg5[%c0_13, %c0_14] : memref<8x128xf32, #tpu.memory_space<vmem>>, vector<8x128xf32>
      %c0_15 = arith.constant 0 : index
      %c0_16 = arith.constant 0 : index
      %21 = vector.load %arg6[%c0_15, %c0_16] : memref<8x128xf32, #tpu.memory_space<vmem>>, vector<8x128xf32>
      %c0_17 = arith.constant 0 : index
      %c0_18 = arith.constant 0 : index
      %22 = vector.load %arg7[%c0_17, %c0_18] : memref<8x1xi32, #tpu.memory_space<vmem>>, vector<8x1xi32>
      %23 = tpu.iota {dimensions = array<i32: 1>} : vector<8x128xi32>
      %c16_i32 = arith.constant 16 : i32
      %24 = vector.broadcast %c16_i32 : i32 to vector<8x128xi32>
      %25 = arith.cmpi slt, %23, %24 : vector<8x128xi32>
      %c8_i32 = arith.constant 8 : i32
      %26 = arith.muli %arg0, %c8_i32 : i32
      %27 = tpu.iota {dimensions = array<i32: 0>} : vector<8x1xi32>
      %28 = vector.broadcast %26 : i32 to vector<8x1xi32>
      %29 = arith.addi %28, %27 : vector<8x1xi32>
      %c2_i32 = arith.constant 2 : i32
      %30 = vector.broadcast %c2_i32 : i32 to vector<8x1xi32>
      %31 = arith.cmpi slt, %29, %30 : vector<8x1xi32>
      %32 = arith.extui %31 : vector<8x1xi1> to vector<8x1xi32>
      %33 = arith.sitofp %32 : vector<8x1xi32> to vector<8x1xf32>
      %cst_19 = arith.constant -1.000000e+30 : f32
      %34 = vector.broadcast %cst_19 : f32 to vector<8x128xf32>
      %35 = arith.select %25, %20, %34 : vector<8x128xi1>, vector<8x128xf32>
      %cst_20 = arith.constant dense<0xFF800000> : vector<8xf32>
      %36 = vector.multi_reduction <maximumf>, %35, %cst_20 [1] : vector<8x128xf32> to vector<8xf32>
      %37 = vector.shape_cast %36 : vector<8xf32> to vector<8x1xf32>
      %38 = vector.broadcast %37 : vector<8x1xf32> to vector<8x128xf32>
      %39 = arith.subf %35, %38 : vector<8x128xf32>
      %40 = math.exp %39 : vector<8x128xf32>
      %cst_21 = arith.constant 0.000000e+00 : f32
      %41 = vector.broadcast %cst_21 : f32 to vector<8x128xf32>
      %42 = arith.select %25, %40, %41 : vector<8x128xi1>, vector<8x128xf32>
      %cst_22 = arith.constant dense<0.000000e+00> : vector<8xf32>
      %43 = vector.multi_reduction <add>, %42, %cst_22 [1] : vector<8x128xf32> to vector<8xf32>
      %44 = vector.shape_cast %43 : vector<8xf32> to vector<8x1xf32>
      %45 = math.log %44 : vector<8x1xf32>
      %46 = arith.addf %45, %37 : vector<8x1xf32>
      %47 = vector.broadcast %46 : vector<8x1xf32> to vector<8x128xf32>
      %48 = arith.subf %35, %47 : vector<8x128xf32>
      %49 = vector.broadcast %22 : vector<8x1xi32> to vector<8x128xi32>
      %50 = arith.cmpi eq, %23, %49 : vector<8x128xi32>
      %51 = arith.andi %50, %25 : vector<8x128xi1>
      %cst_23 = arith.constant 0.000000e+00 : f32
      %52 = vector.broadcast %cst_23 : f32 to vector<8x128xf32>
      %53 = arith.select %51, %48, %52 : vector<8x128xi1>, vector<8x128xf32>
      %cst_24 = arith.constant dense<0.000000e+00> : vector<8xf32>
      %54 = vector.multi_reduction <add>, %53, %cst_24 [1] : vector<8x128xf32> to vector<8xf32>
      %55 = vector.shape_cast %54 : vector<8xf32> to vector<8x1xf32>
      %cst_25 = arith.constant 0.000000e+00 : f32
      %56 = vector.broadcast %cst_25 : f32 to vector<8x1xf32>
      %57 = arith.subf %56, %55 : vector<8x1xf32>
      %cst_26 = arith.constant 5.000000e-01 : f32
      %58 = vector.broadcast %cst_26 : f32 to vector<8x1xf32>
      %59 = arith.mulf %57, %58 : vector<8x1xf32>
      %cst_27 = arith.constant 5.000000e-01 : f32
      %60 = vector.broadcast %cst_27 : f32 to vector<8x128xf32>
      %61 = arith.mulf %21, %60 : vector<8x128xf32>
      %cst_28 = arith.constant -1.000000e+30 : f32
      %62 = vector.broadcast %cst_28 : f32 to vector<8x128xf32>
      %63 = arith.select %25, %61, %62 : vector<8x128xi1>, vector<8x128xf32>
      %cst_29 = arith.constant dense<0xFF800000> : vector<8xf32>
      %64 = vector.multi_reduction <maximumf>, %63, %cst_29 [1] : vector<8x128xf32> to vector<8xf32>
      %65 = vector.shape_cast %64 : vector<8xf32> to vector<8x1xf32>
      %66 = vector.broadcast %65 : vector<8x1xf32> to vector<8x128xf32>
      %67 = arith.subf %63, %66 : vector<8x128xf32>
      %68 = math.exp %67 : vector<8x128xf32>
      %cst_30 = arith.constant 0.000000e+00 : f32
      %69 = vector.broadcast %cst_30 : f32 to vector<8x128xf32>
      %70 = arith.select %25, %68, %69 : vector<8x128xi1>, vector<8x128xf32>
      %cst_31 = arith.constant dense<0.000000e+00> : vector<8xf32>
      %71 = vector.multi_reduction <add>, %70, %cst_31 [1] : vector<8x128xf32> to vector<8xf32>
      %72 = vector.shape_cast %71 : vector<8xf32> to vector<8x1xf32>
      %73 = math.log %72 : vector<8x1xf32>
      %74 = arith.addf %73, %65 : vector<8x1xf32>
      %75 = vector.broadcast %74 : vector<8x1xf32> to vector<8x128xf32>
      %76 = arith.subf %63, %75 : vector<8x128xf32>
      %cst_32 = arith.constant 5.000000e-01 : f32
      %77 = vector.broadcast %cst_32 : f32 to vector<8x128xf32>
      %78 = arith.mulf %19, %77 : vector<8x128xf32>
      %cst_33 = arith.constant -1.000000e+30 : f32
      %79 = vector.broadcast %cst_33 : f32 to vector<8x128xf32>
      %80 = arith.select %25, %78, %79 : vector<8x128xi1>, vector<8x128xf32>
      %cst_34 = arith.constant dense<0xFF800000> : vector<8xf32>
      %81 = vector.multi_reduction <maximumf>, %80, %cst_34 [1] : vector<8x128xf32> to vector<8xf32>
      %82 = vector.shape_cast %81 : vector<8xf32> to vector<8x1xf32>
      %83 = vector.broadcast %82 : vector<8x1xf32> to vector<8x128xf32>
      %84 = arith.subf %80, %83 : vector<8x128xf32>
      %85 = math.exp %84 : vector<8x128xf32>
      %cst_35 = arith.constant 0.000000e+00 : f32
      %86 = vector.broadcast %cst_35 : f32 to vector<8x128xf32>
      %87 = arith.select %25, %85, %86 : vector<8x128xi1>, vector<8x128xf32>
      %cst_36 = arith.constant dense<0.000000e+00> : vector<8xf32>
      %88 = vector.multi_reduction <add>, %87, %cst_36 [1] : vector<8x128xf32> to vector<8xf32>
      %89 = vector.shape_cast %88 : vector<8xf32> to vector<8x1xf32>
      %90 = math.log %89 : vector<8x1xf32>
      %91 = arith.addf %90, %82 : vector<8x1xf32>
      %92 = vector.broadcast %91 : vector<8x1xf32> to vector<8x128xf32>
      %93 = arith.subf %80, %92 : vector<8x128xf32>
      %94 = math.exp %93 : vector<8x128xf32>
      %cst_37 = arith.constant 0.000000e+00 : f32
      %95 = vector.broadcast %cst_37 : f32 to vector<8x128xf32>
      %96 = arith.select %25, %94, %95 : vector<8x128xi1>, vector<8x128xf32>
      %97 = arith.subf %93, %76 : vector<8x128xf32>
      %98 = arith.mulf %96, %97 : vector<8x128xf32>
      %cst_38 = arith.constant 0.000000e+00 : f32
      %99 = vector.broadcast %cst_38 : f32 to vector<8x128xf32>
      %100 = arith.select %25, %98, %99 : vector<8x128xi1>, vector<8x128xf32>
      %cst_39 = arith.constant dense<0.000000e+00> : vector<8xf32>
      %101 = vector.multi_reduction <add>, %100, %cst_39 [1] : vector<8x128xf32> to vector<8xf32>
      %102 = vector.shape_cast %101 : vector<8xf32> to vector<8x1xf32>
      %cst_40 = arith.constant 1.250000e-01 : f32
      %103 = vector.broadcast %cst_40 : f32 to vector<8x1xf32>
      %104 = arith.mulf %102, %103 : vector<8x1xf32>
      %cst_41 = arith.constant 5.000000e-01 : f32
      %105 = vector.broadcast %cst_41 : f32 to vector<8x1xf32>
      %106 = arith.mulf %59, %105 : vector<8x1xf32>
      %cst_42 = arith.constant 5.000000e-01 : f32
      %107 = vector.broadcast %cst_42 : f32 to vector<8x1xf32>
      %108 = arith.mulf %104, %107 : vector<8x1xf32>
      %109 = arith.addf %106, %108 : vector<8x1xf32>
      %110 = arith.mulf %33, %109 : vector<8x1xf32>
      %111 = vector.shape_cast %110 : vector<8x1xf32> to vector<1x8x1xf32>
      %cst_43 = arith.constant dense<0.000000e+00> : vector<1xf32>
      %112 = vector.multi_reduction <add>, %111, %cst_43 [1, 2] : vector<1x8x1xf32> to vector<1xf32>
      %113 = vector.shape_cast %112 : vector<1xf32> to vector<1x1x1xf32>
      %114 = vector.extract %113[0, 0, 0] : f32 from vector<1x1x1xf32>
      %115 = tpu.iota {dimensions = array<i32: 0>} : vector<8x128xi32>
      %116 = tpu.iota {dimensions = array<i32: 1>} : vector<8x128xi32>
      %c0_i32_44 = arith.constant 0 : i32
      %117 = vector.broadcast %c0_i32_44 : i32 to vector<8x128xi32>
      %118 = arith.cmpi eq, %115, %117 : vector<8x128xi32>
      %c0_i32_45 = arith.constant 0 : i32
      %119 = vector.broadcast %c0_i32_45 : i32 to vector<8x128xi32>
      %120 = arith.cmpi eq, %116, %119 : vector<8x128xi32>
      %121 = arith.andi %118, %120 : vector<8x128xi1>
      %cst_46 = arith.constant 0.000000e+00 : f32
      %122 = vector.broadcast %114 : f32 to vector<8x128xf32>
      %123 = vector.broadcast %cst_46 : f32 to vector<8x128xf32>
      %124 = arith.select %121, %122, %123 : vector<8x128xi1>, vector<8x128xf32>
      %c0_47 = arith.constant 0 : index
      %c0_48 = arith.constant 0 : index
      %125 = vector.load %arg8[%c0_47, %c0_48] : memref<8x128xf32, #tpu.memory_space<vmem>>, vector<8x128xf32>
      tpu.vector_store %arg8[%c0_47, %c0_48], %124 {strides = array<i32>} : memref<8x128xf32, #tpu.memory_space<vmem>>, vector<8x128xf32>,
    } else {
    }
    return
  }
  func.func @transform_0(%arg0: i32, %arg1: i32) -> (i32, i32) {
    %c0_i32 = arith.constant 0 : i32
    return %arg0, %arg1 : i32, i32
  }
  func.func @transform_1(%arg0: i32, %arg1: i32) -> (i32, i32) {
    %c0_i32 = arith.constant 0 : i32
    %c0_i32_0 = arith.constant 0 : i32
    %c0_i32_1 = arith.constant 0 : i32
    return %c0_i32, %c0_i32_0 : i32, i32
  }
  func.func @transform_2(%arg0: i32, %arg1: i32) -> (i32, i32) {
    %c0_i32 = arith.constant 0 : i32
    %c0_i32_0 = arith.constant 0 : i32
    %c0_i32_1 = arith.constant 0 : i32
    return %c0_i32, %c0_i32_0 : i32, i32
  }
  func.func @transform_3(%arg0: i32, %arg1: i32) -> (i32, i32) {
    %c0_i32 = arith.constant 0 : i32
    %c0_i32_0 = arith.constant 0 : i32
    return %arg0, %c0_i32 : i32, i32
  }
  func.func @transform_4(%arg0: i32, %arg1: i32) -> (i32, i32) {
    %c0_i32 = arith.constant 0 : i32
    %c0_i32_0 = arith.constant 0 : i32
    return %arg0, %c0_i32 : i32, i32
  }
  func.func @transform_5(%arg0: i32, %arg1: i32) -> (i32, i32) {
    %c0_i32 = arith.constant 0 : i32
    %c0_i32_0 = arith.constant 0 : i32
    return %arg0, %c0_i32 : i32, i32
  }
  func.func @transform_6(%arg0: i32, %arg1: i32) -> (i32, i32) {
    %c0_i32 = arith.constant 0 : i32
    %c0_i32_0 = arith.constant 0 : i32
    return %arg0, %c0_i32 : i32, i32
  }
}

</mosaic_0001>

<bundles_post_ra>
// kernel: tpu_custom_call.1
= control target key start
LH: loop header
LB: loop body
LE: loop exit
PB: predicated region body
PF: predicated region fallthrough
CT: control target
= control target key end

     0   :  { %11 = vsyncpa [#allocation4], 0  ;;  %s1379_s0 = inlined_call_operand.hbm [shape: f32[8,1024], index: 0, kind: input, shape index: {}]   ;;  %s1380_s1 = inlined_call_operand.hbm [shape: bf16[1024,128], index: 1, kind: input, shape index: {}]   ;;  %s1381_s2 = inlined_call_operand.vmem [shape: f32[1,128], index: 2, kind: input, shape index: {}]   ;;  %s1382_s3 = inlined_call_operand.vmem [shape: f32[8,128], index: 3, kind: input, shape index: {}]   ;;  %s1383_s4 = inlined_call_operand.hbm [shape: f32[8,128], index: 4, kind: input, shape index: {}]   ;;  %s1384_s5 = inlined_call_operand.vmem [shape: s32[8,1], index: 5, kind: input, shape index: {}]   ;;  %s1385_s6 = inlined_call_operand.hbm [shape: f32[8,128], index: 6, kind: output, shape index: {}]  }
   0x1   :  { %12 = vsyncpa [#allocation7], 0  ;;  %s29_s23 = sshll.u32 %s1380_s1, 4  ;;  %s30_s23 = int_to_ptr.hbm [resolvable:$true] %s29_s23 }
   0x2   :  { %13 = vsyncpa [#allocation5], 0  ;;  %s1285_s24 = smov [#allocation6]   ;;  %s19_s28 = sshll.u32 %s1379_s0, 4  ;;  %s20_s28 = int_to_ptr.hbm [resolvable:$true] %s19_s28 }
   0x3   :  { %s31_s25 = sshll.u32 %s1285_s24, 4  ;;  %s1286_s29 = smov 64   ;;  %s32_s25 = int_to_ptr.vmem [resolvable:$true] %s31_s25 }
   0x4   :  { %s1287_s30 = smov 4   ;;  %s1288_s7 = smov [#allocation3]  }
   0x5   :  { %37 = dma.hbm_to_vmem [thread:$0]  %s30_s23, 8192, %s32_s25, [#allocation7], %s1286_s29, %s1286_s29, %s1287_s30  }
   0x6   :  { %s21_s8 = sshll.u32 %s1288_s7, 4  ;;  %s47_s11 = sshll.u32 %s1383_s4, 4  ;;  %s22_s8 = int_to_ptr.vmem [resolvable:$true] %s21_s8  ;;  %s48_s11 = int_to_ptr.hbm [resolvable:$true] %s47_s11 }
   0x7   :  { %24 = dma.hbm_to_vmem [thread:$0]  %s20_s28, 1024, %s22_s8, [#allocation4]  }
   0x8   :  { %s1289_s1 = smov [#allocation8]  }
   0x9   :  { %s49_s12 = sshll.u32 %s1289_s1, 4  ;;  %s50_s12 = int_to_ptr.vmem [resolvable:$true] %s49_s12 }
   0xa   :  { %52 = dma.hbm_to_vmem [thread:$0]  %s48_s11, 128, %s50_s12, [#allocation7]  }
   0xb   :  { %1279 = dma.done.wait [#allocation4], 1024  }
   0xc   :  { %1280 = vsyncadd [#allocation4], 4294966272 }
   0xd   :  { %1281 = dma.done.wait [#allocation7], 8320  }
   0xe   :  { %1282 = vsyncadd [#allocation7], 4294958976  ;;  %v1100_v0 = vld [vmem:[#allocation6 + $0x38] sm:$0xff]  ;;  %v1099_v4 = vld [vmem:[#allocation6 + $0x30] sm:$0xff]  ;;  %vm799_vm4 = vcmask 7168   ;;  %s823_s18 = sshll.u32 %s1385_s6, 4  ;;  %s824_s18 = int_to_ptr.hbm [resolvable:$true] %s823_s18 }
   0xf   :  { %v1108_v1 = vld [vmem:[#allocation6 + $0x78] sm:$0xff]  ;;  %606 = vmatpush.bf16.msra.mxu0 %v1100_v0  ;;  %v1107_v5 = vld [vmem:[#allocation6 + $0x70] sm:$0xff]  ;;  %v1098_v8 = vld [vmem:[#allocation6 + $0x28] sm:$0xff] }
  0x10   :  { %v1116_v2 = vld [vmem:[#allocation6 + $0xb8] sm:$0xff]  ;;  %619 = vmatpush.bf16.msra.mxu1 %v1108_v1  ;;  %v1115_v6 = vld [vmem:[#allocation6 + $0xb0] sm:$0xff]  ;;  %v1106_v9 = vld [vmem:[#allocation6 + $0x68] sm:$0xff] }
  0x11   :  { %v1124_v3 = vld [vmem:[#allocation6 + $0xf8] sm:$0xff]  ;;  %632 = vmatpush.bf16.msra.mxu2 %v1116_v2  ;;  %v1123_v7 = vld [vmem:[#allocation6 + $0xf0] sm:$0xff]  ;;  %v1114_v10 = vld [vmem:[#allocation6 + $0xa8] sm:$0xff] }
  0x12   :  { %645 = vmatpush.bf16.msra.mxu3 %v1124_v3  ;;  %v1122_v11 = vld [vmem:[#allocation6 + $0xe8] sm:$0xff]  ;;  %v1097_v12 = vld [vmem:[#allocation6 + $0x20] sm:$0xff]  ;;  %v1096_v16 = vld [vmem:[#allocation6 + $0x18] sm:$0xff] }
  0x13   :  { %607 = vmatpush.bf16.msra.mxu0 %v1099_v4  ;;  %v1105_v13 = vld [vmem:[#allocation6 + $0x60] sm:$0xff]  ;;  %v1104_v17 = vld [vmem:[#allocation6 + $0x58] sm:$0xff]  ;;  %v1095_v20 = vld [vmem:[#allocation6 + $0x10] sm:$0xff] }
  0x14   :  { %620 = vmatpush.bf16.msra.mxu1 %v1107_v5  ;;  %v1113_v14 = vld [vmem:[#allocation6 + $0xa0] sm:$0xff]  ;;  %v1112_v18 = vld [vmem:[#allocation6 + $0x98] sm:$0xff]  ;;  %v1103_v21 = vld [vmem:[#allocation6 + $0x50] sm:$0xff] }
  0x15   :  { %633 = vmatpush.bf16.msra.mxu2 %v1115_v6  ;;  %v1121_v15 = vld [vmem:[#allocation6 + $0xe0] sm:$0xff]  ;;  %v1120_v19 = vld [vmem:[#allocation6 + $0xd8] sm:$0xff]  ;;  %v1111_v22 = vld [vmem:[#allocation6 + $0x90] sm:$0xff] }
  0x16   :  { %646 = vmatpush.bf16.msra.mxu3 %v1123_v7  ;;  %v1119_v23 = vld [vmem:[#allocation6 + $0xd0] sm:$0xff]  ;;  %v1094_v24 = vld [vmem:[#allocation6 + $0x8] sm:$0xff]  ;;  %v1093_v28 = vld [vmem:[#allocation6] sm:$0xff] }
  0x17   :  { %608 = vmatpush.bf16.msra.mxu0 %v1098_v8  ;;  %v1102_v25 = vld [vmem:[#allocation6 + $0x48] sm:$0xff]  ;;  %v1101_v29 = vld [vmem:[#allocation6 + $0x40] sm:$0xff]  ;;  %v1132_v32 = vld [vmem:[#allocation6 + $0x138] sm:$0xff] }
  0x18   :  { %621 = vmatpush.bf16.msra.mxu1 %v1106_v9  ;;  %v1110_v26 = vld [vmem:[#allocation6 + $0x88] sm:$0xff]  ;;  %v1109_v30 = vld [vmem:[#allocation6 + $0x80] sm:$0xff]  ;;  %v208_v33 = vld [vmem:[#allocation3 + $0x10] sm:$0xff] }
  0x19   :  { %634 = vmatpush.bf16.msra.mxu2 %v1114_v10  ;;  %v1118_v27 = vld [vmem:[#allocation6 + $0xc8] sm:$0xff]  ;;  %v1117_v31 = vld [vmem:[#allocation6 + $0xc0] sm:$0xff]  ;;  %v1140_v35 = vld [vmem:[#allocation6 + $0x178] sm:$0xff]  ;;  %v216_v40 = vpack.c.bf16 %v208_v33, %v208_v33 }
  0x1a   :  { %647 = vmatpush.bf16.msra.mxu3 %v1122_v11  ;;  %v206_v34 = vld [vmem:[#allocation3] sm:$0xff]  ;;  %v209_v36 = vld [vmem:[#allocation3 + $0x18] sm:$0xff]  ;;  %v207_v37 = vld [vmem:[#allocation3 + $0x8] sm:$0xff] }
  0x1b   :  { %609 = vmatpush.bf16.msra.mxu0 %v1097_v12  ;;  %v1148_v38 = vld [vmem:[#allocation6 + $0x1b8] sm:$0xff]  ;;  %v214_v41 = vpack.c.bf16 %v206_v34, %v206_v34  ;;  %v217_v42 = vpack.c.bf16 %v209_v36, %v209_v36  ;;  %v215_v43 = vpack.c.bf16 %v207_v37, %v207_v37  ;;  %v1131_v44 = vld [vmem:[#allocation6 + $0x130] sm:$0xff]  ;;  %v1130_v48 = vld [vmem:[#allocation6 + $0x128] sm:$0xff] }
  0x1c   :  { %622 = vmatpush.bf16.msra.mxu1 %v1105_v13  ;;  %v1156_v39 = vld [vmem:[#allocation6 + $0x1f8] sm:$0xff]  ;;  %v1139_v45 = vld [vmem:[#allocation6 + $0x170] sm:$0xff]  ;;  %v1138_v49 = vld [vmem:[#allocation6 + $0x168] sm:$0xff] }
  0x1d   :  { %635 = vmatpush.bf16.msra.mxu2 %v1113_v14  ;;  %v1147_v46 = vld [vmem:[#allocation6 + $0x1b0] sm:$0xff]  ;;  %v1146_v50 = vld [vmem:[#allocation6 + $0x1a8] sm:$0xff]  ;;  %v1129_v52 = vld [vmem:[#allocation6 + $0x120] sm:$0xff] }
  0x1e   :  { %648 = vmatpush.bf16.msra.mxu3 %v1121_v15  ;;  %v1155_v47 = vld [vmem:[#allocation6 + $0x1f0] sm:$0xff]  ;;  %v1154_v51 = vld [vmem:[#allocation6 + $0x1e8] sm:$0xff]  ;;  %v1137_v53 = vld [vmem:[#allocation6 + $0x160] sm:$0xff] }
  0x1f   :  { %610 = vmatpush.bf16.msra.mxu0 %v1096_v16  ;;  %v1145_v54 = vld [vmem:[#allocation6 + $0x1a0] sm:$0xff]  ;;  %v1128_v56 = vld [vmem:[#allocation6 + $0x118] sm:$0xff]  ;;  %v1127_v60 = vld [vmem:[#allocation6 + $0x110] sm:$0xff] }
  0x20   :  { %623 = vmatpush.bf16.msra.mxu1 %v1104_v17  ;;  %v1153_v55 = vld [vmem:[#allocation6 + $0x1e0] sm:$0xff]  ;;  %v1136_v57 = vld [vmem:[#allocation6 + $0x158] sm:$0xff]  ;;  %v1135_v61 = vld [vmem:[#allocation6 + $0x150] sm:$0xff] }
  0x21   :  { %636 = vmatpush.bf16.msra.mxu2 %v1112_v18  ;;  %v1144_v58 = vld [vmem:[#allocation6 + $0x198] sm:$0xff]  ;;  %v1143_v62 = vld [vmem:[#allocation6 + $0x190] sm:$0xff]  ;;  %v1126_v0 = vld [vmem:[#allocation6 + $0x108] sm:$0xff] }
  0x22   :  { %649 = vmatpush.bf16.msra.mxu3 %v1120_v19  ;;  %v1152_v59 = vld [vmem:[#allocation6 + $0x1d8] sm:$0xff]  ;;  %v1151_v63 = vld [vmem:[#allocation6 + $0x1d0] sm:$0xff]  ;;  %v1134_v1 = vld [vmem:[#allocation6 + $0x148] sm:$0xff] }
  0x23   :  { %611 = vmatpush.bf16.msra.mxu0 %v1095_v20  ;;  %v1142_v2 = vld [vmem:[#allocation6 + $0x188] sm:$0xff]  ;;  %v1125_v4 = vld [vmem:[#allocation6 + $0x100] sm:$0xff]  ;;  %v212_v10 = vld [vmem:[#allocation3 + $0x30] sm:$0xff] }
  0x24   :  { %624 = vmatpush.bf16.msra.mxu1 %v1103_v21  ;;  %v1150_v3 = vld [vmem:[#allocation6 + $0x1c8] sm:$0xff]  ;;  %v1133_v5 = vld [vmem:[#allocation6 + $0x140] sm:$0xff]  ;;  %v213_v11 = vld [vmem:[#allocation3 + $0x38] sm:$0xff]  ;;  %v220_v14 = vpack.c.bf16 %v212_v10, %v212_v10 }
  0x25   :  { %637 = vmatpush.bf16.msra.mxu2 %v1111_v22  ;;  %v1141_v6 = vld [vmem:[#allocation6 + $0x180] sm:$0xff]  ;;  %v211_v8 = vld [vmem:[#allocation3 + $0x28] sm:$0xff]  ;;  %v221_v15 = vpack.c.bf16 %v213_v11, %v213_v11 }
  0x26   :  { %650 = vmatpush.bf16.msra.mxu3 %v1119_v23  ;;  %v210_v7 = vld [vmem:[#allocation3 + $0x20] sm:$0xff]  ;;  %v219_v13 = vpack.c.bf16 %v211_v8, %v211_v8  ;;  %v724_v23 = vlaneseq }
  0x27   :  { %612 = vmatpush.bf16.msra.mxu0 %v1094_v24  ;;  %v1149_v9 = vld [vmem:[#allocation6 + $0x1c0] sm:$0xff]  ;;  %v218_v12 = vpack.c.bf16 %v210_v7, %v210_v7 }
  0x28   :  { %625 = vmatpush.bf16.msra.mxu1 %v1102_v25  ;;  %v1338_v25 = vand.u32 127, %v724_v23 }
  0x29   :  { %638 = vmatpush.bf16.msra.mxu2 %v1110_v26 }
  0x2a   :  { %651 = vmatpush.bf16.msra.mxu3 %v1118_v27  ;;  %vm726_vm0 = vcmp.lt.s32.totalorder %v1338_v25, 16  ;;  %v721_v27 = vld [vmem:[%s1382_s3] sm:$0xff]  ;;  %vm811_vm6 = vcmp.eq.s32.totalorder %v1338_v25, 0 }
  0x2b   :  { %613 = vmatpush.bf16.msra.mxu0 %v1093_v28  ;;  %v1346_v28 = vsel %vm726_vm0, %v721_v27, -1e+30 }
  0x2c   :  { %626 = vmatpush.bf16.msra.mxu1 %v1101_v29  ;;  %736 = vmax.xlane.f32.xlu1 %v1346_v28 }
  0x2d   :  { %639 = vmatpush.bf16.msra.mxu2 %v1109_v30 }
  0x2e   :  { %652 = vmatpush.bf16.msra.mxu3 %v1117_v31  ;;  %614 = vmatmul.bf16.vlgmr.msra.gmra.mxu0 %v214_v41 }
  0x2f   :  { %658 = vmatpush.bf16.msrb.mxu0 %v1132_v32  ;;  %627 = vmatmul.bf16.vlgmr.msra.gmra.mxu1 %v215_v43 }
  0x30   :  { %671 = vmatpush.bf16.msrb.mxu1 %v1140_v35  ;;  %640 = vmatmul.bf16.vlgmr.msra.gmra.mxu2 %v216_v40 }
  0x31   :  { %684 = vmatpush.bf16.msrb.mxu2 %v1148_v38  ;;  %653 = vmatmul.bf16.vlgmr.msra.gmra.mxu3 %v217_v42  ;;  %v1168_v38 = vld [vmem:[%s1381_s2] ss:$0 sm:$0xff]  ;;  %s1292_s2 = smov [#allocation9]  }
  0x32   :  { %697 = vmatpush.bf16.msrb.mxu3 %v1156_v39 }
  0x33   :  { %659 = vmatpush.bf16.msrb.mxu0 %v1131_v44 }
  0x34   :  { %672 = vmatpush.bf16.msrb.mxu1 %v1139_v45 }
  0x35   :  { %685 = vmatpush.bf16.msrb.mxu2 %v1147_v46  ;;  %v722_v46 = vld [vmem:[#allocation8] sm:$0xff] }
  0x36   :  { %698 = vmatpush.bf16.msrb.mxu3 %v1155_v47 }
  0x37   :  { %660 = vmatpush.bf16.msrb.mxu0 %v1130_v48  ;;  %v758_v48 = vmul.f32 0.5, %v722_v46 }
  0x38   :  { %673 = vmatpush.bf16.msrb.mxu1 %v1138_v49 }
  0x39   :  { %686 = vmatpush.bf16.msrb.mxu2 %v1146_v50  ;;  %v759_v49 = vsel %vm726_vm0, %v758_v48, -1e+30  ;;  %v723_v50 = vld [vmem:[%s1384_s5] sm:$0xff]  ;;  %s821_s5 = sshll.u32 %s1292_s2, 4  ;;  %s822_s5 = int_to_ptr.vmem [resolvable:$true] %s821_s5 }
  0x3a   :  { %699 = vmatpush.bf16.msrb.mxu3 %v1154_v51  ;;  %v1290_v51 = vmov 0  }
  0x3b   :  { %661 = vmatpush.bf16.msrb.mxu0 %v1129_v52  ;;  %1167 = vset.pattern.permute.xlu0 %v1290_v51 }
  0x3c   :  { %674 = vmatpush.bf16.msrb.mxu1 %v1137_v53 }
  0x3d   :  { %687 = vmatpush.bf16.msrb.mxu2 %v1145_v54 }
  0x3e   :  { %700 = vmatpush.bf16.msrb.mxu3 %v1153_v55 }
  0x3f   :  { %662 = vmatpush.bf16.msrb.mxu0 %v1128_v56 }
  0x40   :  { %675 = vmatpush.bf16.msrb.mxu1 %v1136_v57 }
  0x41   :  { %688 = vmatpush.bf16.msrb.mxu2 %v1144_v58 }
  0x42   :  { %701 = vmatpush.bf16.msrb.mxu3 %v1152_v59 }
  0x43   :  { %663 = vmatpush.bf16.msrb.mxu0 %v1127_v60 }
  0x44   :  { %676 = vmatpush.bf16.msrb.mxu1 %v1135_v61 }
  0x45   :  { %689 = vmatpush.bf16.msrb.mxu2 %v1143_v62 }
  0x46   :  { %702 = vmatpush.bf16.msrb.mxu3 %v1151_v63 }
  0x47   :  { %664 = vmatpush.bf16.msrb.mxu0 %v1126_v0 }
  0x48   :  { %677 = vmatpush.bf16.msrb.mxu1 %v1134_v1 }
  0x49   :  { %690 = vmatpush.bf16.msrb.mxu2 %v1142_v2 }
  0x4a   :  { %703 = vmatpush.bf16.msrb.mxu3 %v1150_v3 }
  0x4b   :  { %665 = vmatpush.bf16.msrb.mxu0 %v1125_v4 }
  0x4c   :  { %678 = vmatpush.bf16.msrb.mxu1 %v1133_v5 }
  0x4d   :  { %691 = vmatpush.bf16.msrb.mxu2 %v1141_v6 }
  0x4e   :  { %704 = vmatpush.bf16.msrb.mxu3 %v1149_v9  ;;  %666 = vmatmul.bf16.vlgmr.msrb.gmra.mxu0 %v218_v12 }
  0x4f   :  { %679 = vmatmul.bf16.vlgmr.msrb.gmra.mxu1 %v219_v13 }
  0x50   :  { %692 = vmatmul.bf16.vlgmr.msrb.gmra.mxu2 %v220_v14 }
  0x51   :  { %705 = vmatmul.bf16.vlgmr.msrb.gmra.mxu3 %v221_v15 }
  0x9f   :  { %v737_v55 = vpop.xlane.xlu1 %736 }
  0xa0   :  { %v738_v58 = vsub.f32 %v1346_v28, %v737_v55 }
  0xa2   :  { %v739_v62 = vmul.f32 1.442695, %v738_v58 }
  0xab   :  { %v615_v16 = vpop.f32.mrf.mxu0 }
  0xac   :  { %v628_v17 = vpop.f32.mrf.mxu1 }
  0xad   :  { %v629_v26 = vadd.f32 %v628_v17, %v615_v16 }
  0xb3   :  { %v641_v18 = vpop.f32.mrf.mxu2  ;;  %v617_v20 = vpop.f32.mrf.mxu0 }
  0xb4   :  { %v654_v19 = vpop.f32.mrf.mxu3  ;;  %v630_v21 = vpop.f32.mrf.mxu1  ;;  %v642_v29 = vadd.f32 %v641_v18, %v629_v26 }
  0xb6   :  { %v655_v30 = vadd.f32 %v654_v19, %v642_v29 }
  0xbb   :  { %v643_v22 = vpop.f32.mrf.mxu2 }
  0xbc   :  { %v656_v24 = vpop.f32.mrf.mxu3 }
  0xcb   :  { %v667_v31 = vpop.f32.mrf.mxu0 }
  0xcc   :  { %v680_v32 = vpop.f32.mrf.mxu1  ;;  %v668_v33 = vadd.f32 %v667_v31, %v655_v30  ;;  %v729_v30 = vshrl.u32 %v724_v23, 7 }
  0xce   :  { %v681_v34 = vadd.f32 %v680_v32, %v668_v33  ;;  %vm732_vm3 = vcmp.lt.s32.totalorder %v729_v30, 2  ;;  %vm810_vm5 = vcmp.eq.s32.totalorder %v729_v30, 0 }
  0xcf   :  { %vm812_vm7 = vmand %vm810_vm5, %vm811_vm6 }
  0xd3   :  { %v693_v35 = vpop.f32.mrf.mxu2  ;;  %v669_v39 = vpop.f32.mrf.mxu0 }
  0xd4   :  { %v706_v36 = vpop.f32.mrf.mxu3  ;;  %v694_v37 = vadd.f32 %v693_v35, %v681_v34  ;;  %v682_v40 = vpop.f32.mrf.mxu1 }
  0xd6   :  { %v707_v41 = vadd.f32 %v706_v36, %v694_v37  ;;  %v1291_v37 = vmov 0.0  }
  0xd8   :  { %v720_v42 = vadd.f32 %v1168_v38, %v707_v41  ;;  %v1092_v38 = vsel %vm732_vm3, 1.0, %v1291_v37 }
  0xda   :  { %v772_v43 = vmul.f32 0.5, %v720_v42 }
  0xdb   :  { %v695_v44 = vpop.f32.mrf.mxu2 }
  0xdc   :  { %v708_v45 = vpop.f32.mrf.mxu3  ;;  %v773_v47 = vsel %vm726_vm0, %v772_v43, -1e+30 }
  0xdd   :  { %774 = vmax.xlane.f32.xlu0 %v773_v47 }
  0xe5   :  { %760 = vmax.xlane.f32.xlu0 %v759_v49 }
  0xf9   :  { %749 = vperm.xlu0 %1167, %v723_v50  }
 0x150   :  { %v775_v52 = vpop.xlane.xlu0 %774 }
 0x151   :  { %v776_v53 = vsub.f32 %v773_v47, %v775_v52 }
 0x153   :  { %v777_v54 = vmul.f32 1.442695, %v776_v53 }
 0x155   :  { %1169 = vpow2.f32 %v777_v54 }
 0x158   :  { %v761_v56 = vpop.xlane.xlu0 %760 }
 0x159   :  { %v762_v57 = vsub.f32 %v759_v49, %v761_v56 }
 0x15b   :  { %v1170_v59 = vpop.eup %1169  ;;  %v763_v60 = vmul.f32 1.442695, %v762_v57 }
 0x15c   :  { %v779_v61 = vsel %vm726_vm0, %v1170_v59, 0.0 }
 0x15d   :  { %1171 = vpow2.f32 %v763_v60  ;;  %780 = vadd.xlane.f32.xlu1 %v779_v61 }
 0x15e   :  { %1173 = vpow2.f32 %v739_v62 }
 0x163   :  { %v1172_v63 = vpop.eup %1171 }
 0x164   :  { %v765_v0 = vsel %vm726_vm0, %v1172_v63, 0.0  ;;  %v1174_v1 = vpop.eup %1173 }
 0x165   :  { %766 = vadd.xlane.f32.xlu2 %v765_v0  ;;  %v741_v2 = vsel %vm726_vm0, %v1174_v1, 0.0 }
 0x16b   :  { %v750_v15 = vpop.permute.xlu0 %749 }
 0x16c   :  { %vm751_vm1 = vcmp.eq.s32.totalorder %v1338_v25, %v750_v15 }
 0x16d   :  { %742 = vadd.xlane.f32.xlu2 %v741_v2  ;;  %vm752_vm2 = vmand %vm751_vm1, %vm726_vm0 }
 0x1d0   :  { %v781_v3 = vpop.xlane.xlu1 %780 }
 0x1d1   :  { %1175 = vlog2.f32 %v781_v3 }
 0x1d7   :  { %v1176_v4 = vpop.eup %1175 }
 0x1d8   :  { %v783_v5 = vmul.f32 0.6931472, %v1176_v4  ;;  %v767_v6 = vpop.xlane.xlu2 %766 }
 0x1d9   :  { %1177 = vlog2.f32 %v767_v6 }
 0x1da   :  { %v784_v7 = vadd.f32 %v783_v5, %v775_v52 }
 0x1dc   :  { %v785_v8 = vsub.f32 %v773_v47, %v784_v7 }
 0x1de   :  { %v786_v9 = vmul.f32 1.442695, %v785_v8 }
 0x1df   :  { %v1178_v10 = vpop.eup %1177 }
 0x1e0   :  { %1179 = vpow2.f32 %v786_v9  ;;  %v769_v11 = vmul.f32 0.6931472, %v1178_v10  ;;  %v743_v12 = vpop.xlane.xlu2 %742 }
 0x1e1   :  { %1181 = vlog2.f32 %v743_v12 }
 0x1e2   :  { %v770_v13 = vadd.f32 %v769_v11, %v761_v56 }
 0x1e4   :  { %v771_v14 = vsub.f32 %v759_v49, %v770_v13 }
 0x1e6   :  { %v1180_v16 = vpop.eup %1179  ;;  %v789_v17 = vsub.f32 %v785_v8, %v771_v14 }
 0x1e7   :  { %v1182_v18 = vpop.eup %1181  ;;  %v788_v19 = vsel %vm726_vm0, %v1180_v16, 0.0 }
 0x1e8   :  { %v745_v20 = vmul.f32 0.6931472, %v1182_v18  ;;  %v790_v21 = vmul.f32 %v789_v17, %v788_v19 }
 0x1ea   :  { %v746_v22 = vadd.f32 %v745_v20, %v737_v55  ;;  %v791_v24 = vsel %vm726_vm0, %v790_v21, 0.0 }
 0x1eb   :  { %792 = vadd.xlane.f32.xlu2 %v791_v24 }
 0x1ec   :  { %v747_v26 = vsub.f32 %v1346_v28, %v746_v22 }
 0x1ee   :  { %v753_v27 = vsel %vm752_vm2, %v747_v26, 0.0 }
 0x1ef   :  { %754 = vadd.xlane.f32.xlu1 %v753_v27 }
 0x25e   :  { %v793_v29 = vpop.xlane.xlu2 %792 }
 0x25f   :  { %v794_v32 = vmul.f32 0.125, %v793_v29 }
 0x261   :  { %v796_v35 = vmul.f32 0.5, %v794_v32 }
 0x262   :  { %v755_v31 = vpop.xlane.xlu1 %754 }
 0x263   :  { %v756_v33 = vsub.f32 0.0, %v755_v31 }
 0x265   :  { %v757_v34 = vmul.f32 0.5, %v756_v33 }
 0x267   :  { %v795_v36 = vmul.f32 0.5, %v757_v34 }
 0x269   :  { %v797_v39 = vadd.f32 %v796_v35, %v795_v36 }
 0x26b   :  { %v798_v40 = vmul.f32 %v1092_v38, %v797_v39 }
 0x26d   :  { %v800_v41 = vsel %vm799_vm4, %v798_v40, 0.0 }
 0x26e   :  { %801 = vadd.xlane.f32.xlu1 %v800_v41 }
 0x2e1   :  { %v802_v28 = vpop.xlane.xlu1 %801 }
 0x2e2   :  { %v803_v42 = vrot.slane %v802_v28, 4 }
 0x2e4   :  { %v804_v43 = vadd.f32 %v803_v42, %v802_v28 }
 0x2e6   :  { %v805_v44 = vrot.slane %v804_v43, 2 }
 0x2e8   :  { %v806_v45 = vadd.f32 %v805_v44, %v804_v43 }
 0x2ea   :  { %v807_v23 = vrot.slane %v806_v45, 1 }
 0x2ec   :  { %v808_v46 = vadd.f32 %v807_v23, %v806_v45 }
 0x2ee   :  { %1157 = vpush %v808_v46 }
 0x31f   :  { %s1158_s19 = spop %1157 }
 0x320   :  { %v813_v47 = vstv %s1158_s19 }
 0x321   :  { %v814_v48 = vsel %vm812_vm7, %v813_v47, 0.0 }
 0x322   :  { %815 = vst [vmem:[#allocation9] sm:$0xff] %v814_v48 }
 0x323   :  { %826 = dma.vmem_to_hbm [thread:$0]  %s822_s5, 128, %s824_s18, [#allocation5]  }
 0x324   :  { %1283 = dma.done.wait [#allocation5], 128  }
 0x325   :  { %1284 = vsyncadd [#allocation5], 4294967168 }
 0x326   :  { %831 = vsyncpa [#allocation4], 1 }
 0x327   :  { %832 = vsyncpa [#allocation7], 1 }
 0x328   :  { %833 = vsyncpa [#allocation5], 1 }

</bundles_post_ra>
